<compile_context>
chip_gen: v7x
topology: tpu7x:2x2x1
jax: 0.10.0
libtpu: 0.0.40
codegen_flags: <defaults>
</compile_context>

<pallas_src>
import functools
import math

import numpy as np
import jax
import jax.numpy as jnp
from jax import lax
from jax.experimental import pallas as pl
from jax.experimental.pallas import tpu as pltpu  # noqa: F401  (TPU backend)

_LANE = 128


def _lanes_for(n: int) -> int:
    # n coefficient lanes + 1 lane for the packed total, rounded up to lane width.
    return max(_LANE, ((n + 1 + _LANE - 1) // _LANE) * _LANE)


def _make_multitask_kernel(n: int, lanes: int):
    def kernel(packed_ref, out_ref):
        losses = packed_ref[0:1, :]                          # (1, lanes) f32
        p = packed_ref[1:2, :]                               # (1, lanes) f32
        lane = lax.broadcasted_iota(jnp.int32, (1, lanes), 1)
        valid = lane < n                                     # mask padded lanes
        c = jnp.exp(-2.0 * p)                                # EUP transcendental
        weighted = jnp.where(valid, losses * c + p, 0.0)     # VPU fma + select
        total = jnp.sum(weighted, axis=1, keepdims=True)     # XLU reduce -> (1,1)
        # Single lane-dense write: coefs in lanes [0:n], total in lane n, 0 elsewhere.
        out_ref[...] = jnp.where(lane == n, total, jnp.where(valid, c, 0.0))

    return kernel


@functools.lru_cache(maxsize=None)
def _build_multitask_call(n: int):
    lanes = _lanes_for(n)
    call = pl.pallas_call(
        _make_multitask_kernel(n, lanes),
        out_shape=jax.ShapeDtypeStruct((1, lanes), jnp.float32),
        in_specs=[pl.BlockSpec((2, lanes), lambda: (0, 0))],
        out_specs=pl.BlockSpec((1, lanes), lambda: (0, 0)),
        cost_estimate=pl.CostEstimate(
            flops=6 * lanes, transcendentals=lanes, bytes_accessed=12 * lanes
        ),
    )
    return call, lanes


def _multitask_forward_impl(losses_vec: jax.Array, penalties_vec: jax.Array):
    """losses_vec, penalties_vec: (n,) f32. Returns (scalar total, (n,) coefs)."""
    n = losses_vec.shape[0]
    call, lanes = _build_multitask_call(n)
    pad = lanes - n
    losses_row = jnp.pad(losses_vec.astype(jnp.float32), (0, pad))
    pen_row = jnp.pad(penalties_vec.astype(jnp.float32), (0, pad))
    packed = jnp.stack([losses_row, pen_row])                # (2, lanes)
    row = call(packed)[0]                                    # (lanes,)
    return row[n], row[:n]


# --- custom VJP so penalties/losses are trainable without differentiating the kernel
@jax.custom_vjp
def multitask_loss(losses_vec: jax.Array, penalties_vec: jax.Array):
    return _multitask_forward_impl(losses_vec, penalties_vec)


def _multitask_fwd(losses_vec, penalties_vec):
    total, coefs = _multitask_forward_impl(losses_vec, penalties_vec)
    return (total, coefs), (losses_vec.astype(jnp.float32), coefs)


def _multitask_bwd(res, cotangents):
    losses_vec, coefs = res
    g_total, g_coefs = cotangents
    # d total / d L_k = c_k ;  d total / d p_k = 1 - 2 L_k c_k ;  d c_k / d p_k = -2 c_k
    d_losses = g_total * coefs
    d_penalties = g_total * (1.0 - 2.0 * losses_vec * coefs) - 2.0 * g_coefs * coefs
    return d_losses, d_penalties


multitask_loss.defvjp(_multitask_fwd, _multitask_bwd)


class MultiTaskLossPallas:
    """JAX/Pallas port of the PyTorch MultiTaskLoss module."""

    def __init__(self, keys_):
        self.keys_ = list(keys_)
        # Deterministic init, same as torch: p = log(1) / 2 == 0.0
        self.p = math.log(1.0) / 2.0
        self.penalties = {k: jnp.float32(self.p) for k in self.keys_}
        # Cached penalties row -- rebuilt only when penalties change.
        self._penalties_row = jnp.full((len(self.keys_),), self.p, dtype=jnp.float32)

        keys = tuple(self.keys_)

        @jax.jit
        def _fwd(loss_dict, penalties_row):
            losses_vec = jnp.stack(
                [jnp.asarray(loss_dict[k], dtype=jnp.float32).reshape(()) for k in keys]
            )
            return multitask_loss(losses_vec, penalties_row)

        self._fwd = _fwd

    def refresh_penalties(self):
        """Call after externally updating self.penalties."""
        self._penalties_row = jnp.stack(
            [jnp.asarray(self.penalties[k], dtype=jnp.float32).reshape(())
             for k in self.keys_]
        )

    def forward(self, loss: dict):
        total, coefs = self._fwd(dict(loss), self._penalties_row)
        # Single device->host transfer for all coefficients (matches torch .item()
        # semantics without N blocking round-trips).
        coefs_host = np.asarray(jax.device_get(coefs))
        coefficients = {k: float(coefs_host[i]) for i, k in enumerate(self.keys_)}
        return total, coefficients


if __name__ == "__main__":
    keys = ["segmentation", "depth", "normals", "edges"]
    module = MultiTaskLossPallas(keys)

    # Deterministic example per-task scalar losses.
    key = jax.random.PRNGKey(0)
    vals = jax.random.uniform(key, (len(keys),), dtype=jnp.float32) * 3.0
    loss_dict = {k: vals[i] for i, k in enumerate(keys)}

    total, coefficients = module.forward(loss_dict)
    total = jax.block_until_ready(total)

    # Reference check in plain JAX.
    p0 = jnp.float32(module.p)
    ref_total = jnp.sum(vals * jnp.exp(-2.0 * p0) + p0)
    assert jnp.allclose(total, ref_total, rtol=1e-5, atol=1e-5), (
        float(total), float(ref_total))
    for k in keys:
        assert abs(coefficients[k] - 1.0) < 1e-5  # exp(-2*0) == 1

    # Gradient check (custom_vjp): d total/d p_k = 1 - 2 L_k c_k ; d total/d L_k = c_k.
    pen_row = module._penalties_row
    gL, gp = jax.grad(lambda l, p: multitask_loss(l, p)[0], argnums=(0, 1))(vals, pen_row)
    c_ref = jnp.exp(-2.0 * pen_row)
    assert jnp.allclose(gL, c_ref, rtol=1e-5, atol=1e-5)
    assert jnp.allclose(gp, 1.0 - 2.0 * vals * c_ref, rtol=1e-5, atol=1e-5)

    print("KERNEL_OK")
</pallas_src>

<mosaic_0001>
module attributes {stable_mosaic.version = 11 : i64} {
  func.func @kernel(%arg0: memref<2x128xf32, #tpu.memory_space<vmem>>, %arg1: memref<1x128xf32, #tpu.memory_space<vmem>>) attributes {dimension_semantics = [], scalar_prefetch = 0 : i64, scratch_operands = 0 : i64, tpu.core_type = #tpu.core_type<tc>} {
    %c0 = arith.constant 0 : index
    %c0_0 = arith.constant 0 : index
    %0 = vector.load %arg0[%c0, %c0_0] : memref<2x128xf32, #tpu.memory_space<vmem>>, vector<1x128xf32>
    %c1 = arith.constant 1 : index
    %c0_1 = arith.constant 0 : index
    %1 = vector.load %arg0[%c1, %c0_1] : memref<2x128xf32, #tpu.memory_space<vmem>>, vector<1x128xf32>
    %2 = tpu.iota {dimensions = array<i32: 1>} : vector<1x128xi32>
    %c4_i32 = arith.constant 4 : i32
    %3 = vector.broadcast %c4_i32 : i32 to vector<1x128xi32>
    %4 = arith.cmpi slt, %2, %3 : vector<1x128xi32>
    %cst = arith.constant -2.000000e+00 : f32
    %5 = vector.broadcast %cst : f32 to vector<1x128xf32>
    %6 = arith.mulf %5, %1 : vector<1x128xf32>
    %7 = math.exp %6 : vector<1x128xf32>
    %8 = arith.mulf %0, %7 : vector<1x128xf32>
    %9 = arith.addf %8, %1 : vector<1x128xf32>
    %cst_2 = arith.constant 0.000000e+00 : f32
    %10 = vector.broadcast %cst_2 : f32 to vector<1x128xf32>
    %11 = arith.select %4, %9, %10 : vector<1x128xi1>, vector<1x128xf32>
    %cst_3 = arith.constant dense<0.000000e+00> : vector<1xf32>
    %12 = vector.multi_reduction <add>, %11, %cst_3 [1] : vector<1x128xf32> to vector<1xf32>
    %13 = vector.shape_cast %12 : vector<1xf32> to vector<1x1xf32>
    %c4_i32_4 = arith.constant 4 : i32
    %14 = vector.broadcast %c4_i32_4 : i32 to vector<1x128xi32>
    %15 = arith.cmpi eq, %2, %14 : vector<1x128xi32>
    %cst_5 = arith.constant 0.000000e+00 : f32
    %16 = vector.broadcast %cst_5 : f32 to vector<1x128xf32>
    %17 = arith.select %4, %7, %16 : vector<1x128xi1>, vector<1x128xf32>
    %18 = vector.shape_cast %13 : vector<1x1xf32> to vector<1x1xf32>
    %19 = vector.broadcast %18 : vector<1x1xf32> to vector<1x128xf32>
    %20 = arith.select %15, %19, %17 : vector<1x128xi1>, vector<1x128xf32>
    %c0_6 = arith.constant 0 : index
    %c0_7 = arith.constant 0 : index
    %21 = vector.load %arg1[%c0_6, %c0_7] : memref<1x128xf32, #tpu.memory_space<vmem>>, vector<1x128xf32>
    tpu.vector_store %arg1[%c0_6, %c0_7], %20 {strides = array<i32>} : memref<1x128xf32, #tpu.memory_space<vmem>>, vector<1x128xf32>,
    return
  }
}

</mosaic_0001>

<bundles_post_ra>
// kernel: _fwd.1
= control target key start
LH: loop header
LB: loop body
LE: loop exit
PB: predicated region body
PF: predicated region fallthrough
CT: control target
= control target key end

     0   :  { %v10_v3 = vlaneseq  ;;  %vm19_vm1 = vcmask 1040384   ;;  %s52_s0 = inlined_call_operand.vmem [shape: f32[2,128], index: 0, kind: input, shape index: {}]   ;;  %s53_s1 = inlined_call_operand.vmem [shape: f32[1,128], index: 1, kind: output, shape index: {}]  }
   0x1   :  { %v9_v0 = vld [vmem:[%s52_s0 + $0x1] sm:$0x1]  ;;  %v8_v5 = vld [vmem:[%s52_s0] sm:$0x1] }
   0x2   :  { %v13_v1 = vmul.f32 -2.0, %v9_v0  ;;  %v11_v4 = vand.u32 127, %v10_v3 }
   0x4   :  { %v14_v2 = vmul.f32 1.442695, %v13_v1  ;;  %vm12_vm0 = vcmp.lt.s32.totalorder %v11_v4, 4  ;;  %vm23_vm2 = vcmp.eq.s32.totalorder %v11_v4, 4 }
   0x6   :  { %31 = vpow2.f32 %v14_v2 }
  0x10   :  { %v32_v6 = vpop.eup %31 }
  0x11   :  { %v16_v7 = vmul.f32 %v32_v6, %v8_v5  ;;  %v24_v8 = vsel %vm12_vm0, %v32_v6, 0.0 }
  0x13   :  { %v17_v9 = vadd.f32 %v16_v7, %v9_v0 }
  0x15   :  { %v18_v10 = vsel %vm12_vm0, %v17_v9, 0.0 }
  0x16   :  { %v20_v11 = vsel %vm19_vm1, %v18_v10, 0.0 }
  0x17   :  { %21 = vadd.xlane.f32.xlu0 %v20_v11 }
  0xa4   :  { %v22_v12 = vpop.xlane.xlu0 %21 }
  0xa5   :  { %v25_v13 = vsel %vm23_vm2, %v22_v12, %v24_v8 }
  0xa6   :  { %26 = vst [vmem:[%s53_s1] sm:$0x1] %v25_v13 }

</bundles_post_ra>
